<compile_context>
chip_gen: v6e
topology: v6e:2x2x1
jax: 0.10.0
libtpu: 0.0.40
codegen_flags: <defaults>
</compile_context>

<pallas_src>
import functools
import math

import numpy as np
import jax
import jax.numpy as jnp
from jax import lax
from jax.experimental import pallas as pl
from jax.experimental.pallas import tpu as pltpu

_BIG = 1.0e9  # self-similarity mask value, matches `torch.eye(bsize) * 1e9`


# ----------------------------------------------------------------------------
# Fused Pallas kernel: whole SupCon.forward for all IPC pairs
# ----------------------------------------------------------------------------
def _supcon_fused_kernel(z_ref, o_ref, *, tau, c, bsz, ipc):
    z = z_ref[...].astype(jnp.float32)                        # (N, D), N = ipc*bsz
    n = ipc * bsz
    inv_tau = 1.0 / tau

    # One MXU matmul provides every inner product needed by every pair.
    # Contract last-vs-last dims -> no RHS transpose (no vxpose).
    g = lax.dot_general(z, z, (((1,), (1,)), ((), ())),
                        preferred_element_type=jnp.float32)    # (N, N)

    row = lax.broadcasted_iota(jnp.int32, (n, n), 0)
    col = lax.broadcasted_iota(jnp.int32, (n, n), 1)
    is_diag = row == col

    if c == 0.0:
        logits = g * inv_tau                                    # dist_f = x @ y.T
    else:
        # Squared norms straight from diag(G): (N,1) column via a lane reduce,
        # (1,N) row via a sublane reduce -- no extra matmul, no VPU square.
        g_diag = jnp.where(is_diag, g, 0.0)
        x2 = jnp.sum(g_diag, axis=1, keepdims=True)             # (N, 1)
        y2 = jnp.sum(g_diag, axis=0, keepdims=True)             # (1, N)

        # Pairwise Poincare distance via the expanded mobius_add(-x, y) norm;
        # the (N, N, D) tensor is never materialized.
        nxy = -g                                                # (-x_i) . y_j
        a = 1.0 + 2.0 * c * nxy + c * y2
        b = 1.0 - c * x2
        denom = 1.0 + 2.0 * c * nxy + (c * c) * x2 * y2 + 1e-5
        norm2 = a * a * x2 + 2.0 * a * b * nxy + b * b * y2
        norm = jnp.sqrt(jnp.maximum(norm2, 0.0)) / denom

        sqrt_c = math.sqrt(c)
        t = jnp.minimum(sqrt_c * norm, 1.0 - 1e-5)              # t >= 0, upper clip only
        # artanh(t) = 0.5*log((1+t)/(1-t)); exact reciprocal kept (see header).
        artanh = 0.5 * jnp.log((1.0 + t) * pl.reciprocal(1.0 - t, approx=False))
        logits = -(2.0 / sqrt_c) * artanh * inv_tau             # (N, N)

    # Mask every self-pair once; the (i,i) diagonal blocks of `masked` are
    # exactly the `logits00 - eye*1e9` each pair needs.
    masked = jnp.where(is_diag, -_BIG, logits)

    # Local eye for the per-pair target diagonal (TPU needs >= 2-D iota).
    r = lax.broadcasted_iota(jnp.int32, (bsz, bsz), 0)
    cc = lax.broadcasted_iota(jnp.int32, (bsz, bsz), 1)
    local_eye = r == cc

    ce_acc = jnp.zeros((bsz, 1), jnp.float32)
    for i in range(ipc):                                        # unrolled: IPC is tiny
        for j in range(ipc):
            if i == j:
                continue
            l01 = logits[i * bsz:(i + 1) * bsz, j * bsz:(j + 1) * bsz]
            l00 = masked[i * bsz:(i + 1) * bsz, i * bsz:(i + 1) * bsz]
            cat = jnp.concatenate([l01, l00], axis=1)           # (B, 2B) single slab
            m = jnp.max(cat, axis=-1, keepdims=True)
            lse = m + jnp.log(jnp.sum(jnp.exp(cat - m), axis=-1, keepdims=True))
            diag = jnp.sum(jnp.where(local_eye, l01, 0.0), axis=-1, keepdims=True)
            ce_acc = ce_acc + (lse - diag)                      # per-example CE

    # forward(): each compute_loss is a batch mean and the sum is divided by
    # step = IPC*IPC.  Single scalar leaves the kernel via SMEM.
    o_ref[0, 0] = jnp.sum(ce_acc) * (1.0 / (bsz * ipc * ipc))


def supcon_forward(X, T, *, tau=0.2, hyp_c=0.1, IPC=1):
    """SupCon.forward: X is (B, IPC, D); T (labels) is unused, as in PyTorch."""
    del T
    if IPC < 2:
        return jnp.float32(0.0)                                 # no i != j pairs
    B, ipc, D = X.shape
    assert ipc == IPC
    # One contiguous (IPC*B, D) slab so the kernel never sees strided slices.
    Z = jnp.transpose(X, (1, 0, 2)).reshape(IPC * B, D)

    kern = functools.partial(_supcon_fused_kernel, tau=float(tau),
                             c=float(hyp_c), bsz=B, ipc=IPC)
    out = pl.pallas_call(
        kern,
        out_shape=jax.ShapeDtypeStruct((1, 1), jnp.float32),
        out_specs=pl.BlockSpec(memory_space=pltpu.MemorySpace.SMEM),
    )(Z)
    return out[0, 0]


# ----------------------------------------------------------------------------
# Plain-JAX glue: map raw embeddings onto the Poincare ball (input prep only,
# not part of the SupCon module itself)
# ----------------------------------------------------------------------------
def to_hyperbolic(x, c, clip_r):
    x_norm = jnp.linalg.norm(x, axis=-1, keepdims=True) + 1e-5
    x = x * jnp.minimum(jnp.ones_like(x_norm), clip_r / x_norm)         # feature clip
    sqrt_c = c ** 0.5
    u_norm = jnp.maximum(jnp.linalg.norm(x, axis=-1, keepdims=True), 1e-5)
    gamma = jnp.tanh(sqrt_c * u_norm) * x / (sqrt_c * u_norm)           # expmap0
    norm = jnp.maximum(jnp.linalg.norm(gamma, axis=-1, keepdims=True), 1e-5)
    maxnorm = (1.0 - 1e-3) / sqrt_c
    return jnp.where(norm > maxnorm, gamma / norm * maxnorm, gamma)     # project


# ----------------------------------------------------------------------------
# Pure-JAX reference (faithful to the PyTorch code) for the correctness check
# ----------------------------------------------------------------------------
def _mobius_add_batch_ref(x, y, c):
    xy = jnp.einsum("ij,kj->ik", x, y)
    x2 = jnp.sum(x * x, axis=-1, keepdims=True)
    y2 = jnp.sum(y * y, axis=-1, keepdims=True)
    num = (1 + 2 * c * xy + c * y2.T)[:, :, None] * x[:, None, :]
    num = num + (1 - c * x2)[:, :, None] * y[None, :, :]
    denom = 1 + 2 * c * xy + (c ** 2) * x2 * y2.T
    return num / (denom[:, :, None] + 1e-5)


def _dist_matrix_ref(x, y, c):
    sqrt_c = c ** 0.5
    madd = _mobius_add_batch_ref(-x, y, c)
    t = jnp.clip(sqrt_c * jnp.linalg.norm(madd, axis=-1), -1 + 1e-5, 1 - 1e-5)
    return 2.0 / sqrt_c * jnp.arctanh(t)


def _compute_loss_ref(x0, x1, tau, c):
    bsz = x0.shape[0]
    dist_f = (lambda a, b: a @ b.T) if c == 0 else (lambda a, b: -_dist_matrix_ref(a, b, c))
    eye_mask = jnp.eye(bsz, dtype=jnp.float32) * _BIG
    logits00 = dist_f(x0, x0) / tau - eye_mask
    logits01 = dist_f(x0, x1) / tau
    logits = jnp.concatenate([logits01, logits00], axis=1)
    logits = logits - jnp.max(logits, axis=1, keepdims=True)
    m = jnp.max(logits, axis=1, keepdims=True)
    lse = m + jnp.log(jnp.sum(jnp.exp(logits - m), axis=1, keepdims=True))
    picked = logits[jnp.arange(bsz), jnp.arange(bsz)]                   # target = arange(bsz)
    return jnp.mean(lse[:, 0] - picked)


def supcon_forward_ref(X, T, *, tau=0.2, hyp_c=0.1, IPC=1):
    del T
    loss = jnp.float32(0.0)
    step = 0
    for i in range(IPC):
        for j in range(IPC):
            if i != j:
                loss = loss + _compute_loss_ref(X[:, i], X[:, j], tau, hyp_c)
            step += 1
    return loss / step


# ----------------------------------------------------------------------------
# Main
# ----------------------------------------------------------------------------
if __name__ == "__main__":
    bs, IPC, D = 32, 2, 32
    tau, hyp_c, clip_r = 0.2, 0.1, 2.3

    key = jax.random.PRNGKey(0)
    kx, ky = jax.random.split(key)
    X_raw = jax.random.normal(kx, (bs, IPC, D), dtype=jnp.float32)
    X = to_hyperbolic(X_raw, hyp_c, clip_r)     # embeddings already on the Poincare ball
    T = jax.random.randint(ky, (bs,), 0, 4)     # labels (unused by SupCon.forward)

    loss = supcon_forward(X, T, tau=tau, hyp_c=hyp_c, IPC=IPC)
    loss = jax.block_until_ready(loss)
    assert jnp.isfinite(loss)

    ref = jax.block_until_ready(supcon_forward_ref(X, T, tau=tau, hyp_c=hyp_c, IPC=IPC))
    np.testing.assert_allclose(np.asarray(loss), np.asarray(ref), rtol=2e-3, atol=2e-3)

    print("KERNEL_OK")
</pallas_src>

<mosaic_0001>
module attributes {stable_mosaic.version = 11 : i64} {
  func.func @_supcon_fused_kernel(%arg0: memref<64x32xf32, #tpu.memory_space<vmem>>, %arg1: memref<1x1xf32, #tpu.memory_space<smem>>) attributes {dimension_semantics = [], scalar_prefetch = 0 : i64, scratch_operands = 0 : i64, tpu.core_type = #tpu.core_type<tc>} {
    %c0 = arith.constant 0 : index
    %c0_0 = arith.constant 0 : index
    %0 = vector.load %arg0[%c0, %c0_0] : memref<64x32xf32, #tpu.memory_space<vmem>>, vector<64x32xf32>
    %cst = arith.constant dense<0.000000e+00> : vector<64x64xf32>
    %1 = tpu.matmul %0, %0, %cst {dimension_numbers = #tpu.dot_dimension_numbers<[1], [1], [0], [0], [0, 0, 1, 0], [], []>} : vector<64x32xf32>, vector<64x32xf32>, vector<64x64xf32> -> vector<64x64xf32>
    %2 = tpu.iota {dimensions = array<i32: 0>} : vector<64x64xi32>
    %3 = tpu.iota {dimensions = array<i32: 1>} : vector<64x64xi32>
    %4 = arith.cmpi eq, %2, %3 : vector<64x64xi32>
    %cst_1 = arith.constant 0.000000e+00 : f32
    %5 = vector.broadcast %cst_1 : f32 to vector<64x64xf32>
    %6 = arith.select %4, %1, %5 : vector<64x64xi1>, vector<64x64xf32>
    %cst_2 = arith.constant dense<0.000000e+00> : vector<64xf32>
    %7 = vector.multi_reduction <add>, %6, %cst_2 [1] : vector<64x64xf32> to vector<64xf32>
    %8 = vector.shape_cast %7 : vector<64xf32> to vector<64x1xf32>
    %cst_3 = arith.constant dense<0.000000e+00> : vector<64xf32>
    %9 = vector.multi_reduction <add>, %6, %cst_3 [0] : vector<64x64xf32> to vector<64xf32>
    %10 = vector.shape_cast %9 : vector<64xf32> to vector<1x64xf32>
    %cst_4 = arith.constant 0.000000e+00 : f32
    %11 = vector.broadcast %cst_4 : f32 to vector<64x64xf32>
    %12 = arith.subf %11, %1 : vector<64x64xf32>
    %cst_5 = arith.constant 2.000000e-01 : f32
    %13 = vector.broadcast %cst_5 : f32 to vector<64x64xf32>
    %14 = arith.mulf %13, %12 : vector<64x64xf32>
    %cst_6 = arith.constant 1.000000e+00 : f32
    %15 = vector.broadcast %cst_6 : f32 to vector<64x64xf32>
    %16 = arith.addf %15, %14 : vector<64x64xf32>
    %cst_7 = arith.constant 1.000000e-01 : f32
    %17 = vector.broadcast %cst_7 : f32 to vector<1x64xf32>
    %18 = arith.mulf %17, %10 : vector<1x64xf32>
    %19 = vector.broadcast %18 : vector<1x64xf32> to vector<64x64xf32>
    %20 = arith.addf %16, %19 : vector<64x64xf32>
    %cst_8 = arith.constant 1.000000e-01 : f32
    %21 = vector.broadcast %cst_8 : f32 to vector<64x1xf32>
    %22 = arith.mulf %21, %8 : vector<64x1xf32>
    %cst_9 = arith.constant 1.000000e+00 : f32
    %23 = vector.broadcast %cst_9 : f32 to vector<64x1xf32>
    %24 = arith.subf %23, %22 : vector<64x1xf32>
    %cst_10 = arith.constant 2.000000e-01 : f32
    %25 = vector.broadcast %cst_10 : f32 to vector<64x64xf32>
    %26 = arith.mulf %25, %12 : vector<64x64xf32>
    %cst_11 = arith.constant 1.000000e+00 : f32
    %27 = vector.broadcast %cst_11 : f32 to vector<64x64xf32>
    %28 = arith.addf %27, %26 : vector<64x64xf32>
    %cst_12 = arith.constant 0.00999999977 : f32
    %29 = vector.broadcast %cst_12 : f32 to vector<64x1xf32>
    %30 = arith.mulf %29, %8 : vector<64x1xf32>
    %31 = vector.broadcast %30 : vector<64x1xf32> to vector<64x64xf32>
    %32 = vector.broadcast %10 : vector<1x64xf32> to vector<64x64xf32>
    %33 = arith.mulf %31, %32 : vector<64x64xf32>
    %34 = arith.addf %28, %33 : vector<64x64xf32>
    %cst_13 = arith.constant 9.99999974E-6 : f32
    %35 = vector.broadcast %cst_13 : f32 to vector<64x64xf32>
    %36 = arith.addf %34, %35 : vector<64x64xf32>
    %37 = arith.mulf %20, %20 : vector<64x64xf32>
    %38 = vector.broadcast %8 : vector<64x1xf32> to vector<64x64xf32>
    %39 = arith.mulf %37, %38 : vector<64x64xf32>
    %cst_14 = arith.constant 2.000000e+00 : f32
    %40 = vector.broadcast %cst_14 : f32 to vector<64x64xf32>
    %41 = arith.mulf %40, %20 : vector<64x64xf32>
    %42 = vector.broadcast %24 : vector<64x1xf32> to vector<64x64xf32>
    %43 = arith.mulf %41, %42 : vector<64x64xf32>
    %44 = arith.mulf %43, %12 : vector<64x64xf32>
    %45 = arith.addf %39, %44 : vector<64x64xf32>
    %46 = arith.mulf %24, %24 : vector<64x1xf32>
    %47 = vector.broadcast %46 : vector<64x1xf32> to vector<64x64xf32>
    %48 = vector.broadcast %10 : vector<1x64xf32> to vector<64x64xf32>
    %49 = arith.mulf %47, %48 : vector<64x64xf32>
    %50 = arith.addf %45, %49 : vector<64x64xf32>
    %cst_15 = arith.constant 0.000000e+00 : f32
    %51 = vector.broadcast %cst_15 : f32 to vector<64x64xf32>
    %52 = arith.maximumf %50, %51 : vector<64x64xf32>
    %53 = math.sqrt %52 : vector<64x64xf32>
    %54 = arith.divf %53, %36 : vector<64x64xf32>
    %cst_16 = arith.constant 0.316227764 : f32
    %55 = vector.broadcast %cst_16 : f32 to vector<64x64xf32>
    %56 = arith.mulf %55, %54 : vector<64x64xf32>
    %cst_17 = arith.constant 0.999989986 : f32
    %57 = vector.broadcast %cst_17 : f32 to vector<64x64xf32>
    %58 = arith.minimumf %56, %57 : vector<64x64xf32>
    %cst_18 = arith.constant 1.000000e+00 : f32
    %59 = vector.broadcast %cst_18 : f32 to vector<64x64xf32>
    %60 = arith.addf %59, %58 : vector<64x64xf32>
    %cst_19 = arith.constant 1.000000e+00 : f32
    %61 = vector.broadcast %cst_19 : f32 to vector<64x64xf32>
    %62 = arith.subf %61, %58 : vector<64x64xf32>
    %63 = tpu.reciprocal %62 : vector<64x64xf32> -> vector<64x64xf32>
    %64 = arith.mulf %60, %63 : vector<64x64xf32>
    %65 = math.log %64 : vector<64x64xf32>
    %cst_20 = arith.constant 5.000000e-01 : f32
    %66 = vector.broadcast %cst_20 : f32 to vector<64x64xf32>
    %67 = arith.mulf %66, %65 : vector<64x64xf32>
    %cst_21 = arith.constant -6.32455539 : f32
    %68 = vector.broadcast %cst_21 : f32 to vector<64x64xf32>
    %69 = arith.mulf %68, %67 : vector<64x64xf32>
    %cst_22 = arith.constant 5.000000e+00 : f32
    %70 = vector.broadcast %cst_22 : f32 to vector<64x64xf32>
    %71 = arith.mulf %69, %70 : vector<64x64xf32>
    %cst_23 = arith.constant -1.000000e+09 : f32
    %72 = vector.broadcast %cst_23 : f32 to vector<64x64xf32>
    %73 = arith.select %4, %72, %71 : vector<64x64xi1>, vector<64x64xf32>
    %74 = tpu.iota {dimensions = array<i32: 0>} : vector<32x32xi32>
    %75 = tpu.iota {dimensions = array<i32: 1>} : vector<32x32xi32>
    %76 = arith.cmpi eq, %74, %75 : vector<32x32xi32>
    %cst_24 = arith.constant 0.000000e+00 : f32
    %77 = vector.broadcast %cst_24 : f32 to vector<32x1xf32>
    %78 = vector.extract_strided_slice %71 {offsets = [0, 32], sizes = [32, 32], strides = [1, 1]} : vector<64x64xf32> to vector<32x32xf32>
    %79 = vector.extract_strided_slice %73 {offsets = [0, 0], sizes = [32, 32], strides = [1, 1]} : vector<64x64xf32> to vector<32x32xf32>
    %80 = tpu.concatenate %78, %79 in 1 : vector<32x32xf32>, vector<32x32xf32> -> vector<32x64xf32>
    %cst_25 = arith.constant dense<0xFF800000> : vector<32xf32>
    %81 = vector.multi_reduction <maximumf>, %80, %cst_25 [1] : vector<32x64xf32> to vector<32xf32>
    %82 = vector.shape_cast %81 : vector<32xf32> to vector<32x1xf32>
    %83 = vector.broadcast %82 : vector<32x1xf32> to vector<32x64xf32>
    %84 = arith.subf %80, %83 : vector<32x64xf32>
    %85 = math.exp %84 : vector<32x64xf32>
    %cst_26 = arith.constant dense<0.000000e+00> : vector<32xf32>
    %86 = vector.multi_reduction <add>, %85, %cst_26 [1] : vector<32x64xf32> to vector<32xf32>
    %87 = vector.shape_cast %86 : vector<32xf32> to vector<32x1xf32>
    %88 = math.log %87 : vector<32x1xf32>
    %89 = arith.addf %82, %88 : vector<32x1xf32>
    %cst_27 = arith.constant 0.000000e+00 : f32
    %90 = vector.broadcast %cst_27 : f32 to vector<32x32xf32>
    %91 = arith.select %76, %78, %90 : vector<32x32xi1>, vector<32x32xf32>
    %cst_28 = arith.constant dense<0.000000e+00> : vector<32xf32>
    %92 = vector.multi_reduction <add>, %91, %cst_28 [1] : vector<32x32xf32> to vector<32xf32>
    %93 = vector.shape_cast %92 : vector<32xf32> to vector<32x1xf32>
    %94 = arith.subf %89, %93 : vector<32x1xf32>
    %95 = arith.addf %77, %94 : vector<32x1xf32>
    %96 = vector.extract_strided_slice %71 {offsets = [32, 0], sizes = [32, 32], strides = [1, 1]} : vector<64x64xf32> to vector<32x32xf32>
    %97 = vector.extract_strided_slice %73 {offsets = [32, 32], sizes = [32, 32], strides = [1, 1]} : vector<64x64xf32> to vector<32x32xf32>
    %98 = tpu.concatenate %96, %97 in 1 : vector<32x32xf32>, vector<32x32xf32> -> vector<32x64xf32>
    %cst_29 = arith.constant dense<0xFF800000> : vector<32xf32>
    %99 = vector.multi_reduction <maximumf>, %98, %cst_29 [1] : vector<32x64xf32> to vector<32xf32>
    %100 = vector.shape_cast %99 : vector<32xf32> to vector<32x1xf32>
    %101 = vector.broadcast %100 : vector<32x1xf32> to vector<32x64xf32>
    %102 = arith.subf %98, %101 : vector<32x64xf32>
    %103 = math.exp %102 : vector<32x64xf32>
    %cst_30 = arith.constant dense<0.000000e+00> : vector<32xf32>
    %104 = vector.multi_reduction <add>, %103, %cst_30 [1] : vector<32x64xf32> to vector<32xf32>
    %105 = vector.shape_cast %104 : vector<32xf32> to vector<32x1xf32>
    %106 = math.log %105 : vector<32x1xf32>
    %107 = arith.addf %100, %106 : vector<32x1xf32>
    %cst_31 = arith.constant 0.000000e+00 : f32
    %108 = vector.broadcast %cst_31 : f32 to vector<32x32xf32>
    %109 = arith.select %76, %96, %108 : vector<32x32xi1>, vector<32x32xf32>
    %cst_32 = arith.constant dense<0.000000e+00> : vector<32xf32>
    %110 = vector.multi_reduction <add>, %109, %cst_32 [1] : vector<32x32xf32> to vector<32xf32>
    %111 = vector.shape_cast %110 : vector<32xf32> to vector<32x1xf32>
    %112 = arith.subf %107, %111 : vector<32x1xf32>
    %113 = arith.addf %95, %112 : vector<32x1xf32>
    %114 = vector.shape_cast %113 : vector<32x1xf32> to vector<1x32x1xf32>
    %cst_33 = arith.constant dense<0.000000e+00> : vector<1xf32>
    %115 = vector.multi_reduction <add>, %114, %cst_33 [1, 2] : vector<1x32x1xf32> to vector<1xf32>
    %116 = vector.shape_cast %115 : vector<1xf32> to vector<1x1x1xf32>
    %117 = vector.extract %116[0, 0, 0] : f32 from vector<1x1x1xf32>
    %cst_34 = arith.constant 7.812500e-03 : f32
    %118 = arith.mulf %117, %cst_34 : f32
    %c0_35 = arith.constant 0 : index
    %c0_36 = arith.constant 0 : index
    %119 = memref.load %arg1[%c0_35, %c0_36] : memref<1x1xf32, #tpu.memory_space<smem>>
    memref.store %118, %arg1[%c0_35, %c0_36] : memref<1x1xf32, #tpu.memory_space<smem>>
    return
  }
}

</mosaic_0001>

<bundles_post_ra>
// kernel: tpu_custom_call.1
= control target key start
LH: loop header
LB: loop body
LE: loop exit
PB: predicated region body
PF: predicated region fallthrough
CT: control target
= control target key end

     0   :  { %vm17_vm0 = vcmask 261120   ;;  %s1441_s0 = inlined_call_operand.vmem [shape: f32[64,32], index: 0, kind: input, shape index: {}]   ;;  %s1442_s1 = inlined_call_operand.hbm [shape: f32[1,1], index: 1, kind: output, shape index: {}]  }
   0x1   :  { %v16_v0 = vld [vmem:[%s1441_s0 + $0x38] sm:$0xff]  ;;  %v15_v1 = vld [vmem:[%s1441_s0 + $0x30] sm:$0xff] }
   0x2   :  { %790 = vmatprep.subr.msk.mxu0 %vm17_vm0, %v16_v0  ;;  %818 = vmatprep.subr.msk.mxu1 %vm17_vm0, %v16_v0 }
   0x3   :  { %791 = vmatpush3.xpose.msk.msra.mxu0 %vm17_vm0, %v16_v0  ;;  %826 = vmatpush3.xpose.msk.msra.mxu1 %vm17_vm0, %v16_v0 }
   0x4   :  { %6 = vsyncpa [#allocation3], 0  ;;  %792 = vmatprep.subr.msk.mxu0 %vm17_vm0, %v15_v1  ;;  %819 = vmatprep.subr.msk.mxu1 %vm17_vm0, %v15_v1  ;;  %v13_v2 = vld [vmem:[%s1441_s0 + $0x20] sm:$0xff]  ;;  %v14_v4 = vld [vmem:[%s1441_s0 + $0x28] sm:$0xff]  ;;  %v147_v8 = vlaneseq  ;;  %vm174_vm3 = vcmask 523264   ;;  %s946_s22 = smov 32  }
   0x5   :  { %v9_v3 = vld [vmem:[%s1441_s0] sm:$0xff]  ;;  %812 = vmatprep.mubr.msk.f32.mxu1 %vm17_vm0, %v13_v2  ;;  %v12_v5 = vld [vmem:[%s1441_s0 + $0x18] sm:$0xff]  ;;  %v11_v6 = vld [vmem:[%s1441_s0 + $0x10] sm:$0xff]  ;;  %s947_s25 = smov [#allocation2]  }
   0x6   :  { %806 = vmatprep.mubr.msk.f32.mxu0 %vm17_vm0, %v9_v3  ;;  %v10_v7 = vld [vmem:[%s1441_s0 + $0x8] sm:$0xff]  ;;  %v1022_v9 = vshrl.u32 %v147_v8, 7  ;;  %v1024_v10 = vand.u32 127, %v147_v8  ;;  %s945_s0 = smov 96  }
   0x7   :  { %793 = vmatpush3.xpose.msk.msra.mxu0 %vm17_vm0, %v15_v1  ;;  %827 = vmatpush3.xpose.msk.msra.mxu1 %vm17_vm0, %v15_v1 }
   0x8   :  { %794 = vmatprep.subr.msk.mxu0 %vm17_vm0, %v14_v4  ;;  %820 = vmatprep.subr.msk.mxu1 %vm17_vm0, %v14_v4  ;;  %v1027_v11 = vadd.s32 8, %v1022_v9  ;;  %vm158_vm2 = vcmp.eq.s32.totalorder %v1022_v9, %v1024_v10  ;;  %v1036_v13 = vadd.s32 16, %v1022_v9  ;;  %v1041_v15 = vadd.s32 32, %v1022_v9 }
   0x9   :  { %v1044_v16 = vadd.s32 24, %v1022_v9  ;;  %v1055_v20 = vadd.s32 40, %v1022_v9  ;;  %v1071_v25 = vadd.s32 48, %v1022_v9  ;;  %v1081_v29 = vadd.s32 56, %v1022_v9 }
   0xa   :  { %vm159_vm1 = vcmp.eq.s32.totalorder %v1027_v11, %v1024_v10  ;;  %vm160_vm4 = vcmp.eq.s32.totalorder %v1036_v13, %v1024_v10  ;;  %vm162_vm5 = vcmp.eq.s32.totalorder %v1041_v15, %v1024_v10 }
   0xb   :  { %795 = vmatpush3.xpose.msk.msra.mxu0 %vm17_vm0, %v14_v4  ;;  %828 = vmatpush3.xpose.msk.msra.mxu1 %vm17_vm0, %v14_v4  ;;  %1453 = vst [vmem:[#allocation5_spill] sm:$0xff] %v1055_v20  ;;  %1454 = vst [vmem:[#allocation6_spill] sm:$0xff] %v1071_v25  ;;  %vm161_vm6 = vcmp.eq.s32.totalorder %v1044_v16, %v1024_v10  ;;  %vm163_vm7 = vcmp.eq.s32.totalorder %v1055_v20, %v1024_v10 }
   0xc   :  { %796 = vmatprep.subr.msk.mxu0 %vm17_vm0, %v13_v2  ;;  %821 = vmatprep.subr.msk.mxu1 %vm17_vm0, %v13_v2  ;;  %1455 = vst [vmem:[#allocation7_spill] sm:$0xff] %v1081_v29  ;;  %vm164_vm8 = vcmp.eq.s32.totalorder %v1071_v25, %v1024_v10  ;;  %vm165_vm9 = vcmp.eq.s32.totalorder %v1081_v29, %v1024_v10 }
   0xf   :  { %797 = vmatpush3.xpose.msk.msra.mxu0 %vm17_vm0, %v13_v2  ;;  %829 = vmatpush3.xpose.msk.msra.mxu1 %vm17_vm0, %v13_v2 }
  0x10   :  { %798 = vmatprep.subr.msk.mxu0 %vm17_vm0, %v12_v5  ;;  %822 = vmatprep.subr.msk.mxu1 %vm17_vm0, %v12_v5 }
  0x13   :  { %799 = vmatpush3.xpose.msk.msra.mxu0 %vm17_vm0, %v12_v5  ;;  %830 = vmatpush3.xpose.msk.msra.mxu1 %vm17_vm0, %v12_v5 }
  0x14   :  { %800 = vmatprep.subr.msk.mxu0 %vm17_vm0, %v11_v6  ;;  %823 = vmatprep.subr.msk.mxu1 %vm17_vm0, %v11_v6 }
  0x17   :  { %801 = vmatpush3.xpose.msk.msra.mxu0 %vm17_vm0, %v11_v6  ;;  %831 = vmatpush3.xpose.msk.msra.mxu1 %vm17_vm0, %v11_v6 }
  0x18   :  { %802 = vmatprep.subr.msk.mxu0 %vm17_vm0, %v10_v7  ;;  %824 = vmatprep.subr.msk.mxu1 %vm17_vm0, %v10_v7 }
  0x1b   :  { %803 = vmatpush3.xpose.msk.msra.mxu0 %vm17_vm0, %v10_v7  ;;  %832 = vmatpush3.xpose.msk.msra.mxu1 %vm17_vm0, %v10_v7 }
  0x1c   :  { %804 = vmatprep.subr.msk.mxu0 %vm17_vm0, %v9_v3  ;;  %825 = vmatprep.subr.msk.mxu1 %vm17_vm0, %v9_v3 }
  0x1f   :  { %805 = vmatpush3.xpose.msk.msra.mxu0 %vm17_vm0, %v9_v3  ;;  %833 = vmatpush3.xpose.msk.msra.mxu1 %vm17_vm0, %v9_v3 }
  0x22   :  { %807 = vmatmul.mubr.msk.f32.vlgmr.msra.gmra.mxu0 %vm17_vm0, %v10_v7  ;;  %813 = vmatmul.mubr.msk.f32.vlgmr.msra.gmra.mxu1 %vm17_vm0, %v14_v4 }
  0x23   :  { %809 = vmatprep.mubr.msk.f32.mxu0 %vm17_vm0, %v11_v6  ;;  %815 = vmatprep.mubr.msk.f32.mxu1 %vm17_vm0, %v15_v1 }
  0x26   :  { %810 = vmatmul.mubr.msk.f32.gmra.mxu0 %vm17_vm0, %v12_v5  ;;  %816 = vmatmul.mubr.msk.f32.gmra.mxu1 %vm17_vm0, %v16_v0 }
  0xe2   :  { %v1031_v12 = vpop.f32.mrf.mxu0  ;;  %v1038_v14 = vpop.f32.mrf.mxu1 }
  0xe3   :  { %v167_v18 = vsel %vm159_vm1, %v1031_v12, 0.0  ;;  %v171_v37 = vsel %vm163_vm7, %v1038_v14, 0.0  ;;  %v1449_v62 = vsub.f32 0.0, %v1031_v12  ;;  %v1444_v0 = vsub.f32 0.0, %v1038_v14 }
  0xe4   :  { %v1046_v17 = vpop.f32.mrf.mxu0  ;;  %v1052_v19 = vpop.f32.mrf.mxu1  ;;  %v178_v26 = vsel %vm174_vm3, %v167_v18, 0.0  ;;  %v190_v41 = vsel %vm174_vm3, %v171_v37, 0.0 }
  0xe5   :  { %v166_v21 = vsel %vm158_vm2, %v1046_v17, 0.0  ;;  %v170_v31 = vsel %vm162_vm5, %v1052_v19, 0.0  ;;  %v212_v60 = vsub.f32 0.0, %v1046_v17  ;;  %v1447_v61 = vsub.f32 0.0, %v1052_v19 }
  0xe6   :  { %v1061_v22 = vpop.f32.mrf.mxu0  ;;  %v175_v23 = vsel %vm174_vm3, %v166_v21, 0.0  ;;  %v1066_v24 = vpop.f32.mrf.mxu1  ;;  %v187_v38 = vsel %vm174_vm3, %v170_v31, 0.0  ;;  %v221_v5 = vmul.f32 0.2, %v1449_v62  ;;  %v225_v7 = vmul.f32 0.2, %v1444_v0 }
  0xe7   :  { %176 = vadd.xlane.f32.xlu0 %v175_v23  ;;  %v199_v28 = vadd.f32 %v178_v26, %v175_v23  ;;  %v169_v33 = vsel %vm161_vm6, %v1061_v22, 0.0  ;;  %v173_v43 = vsel %vm165_vm9, %v1066_v24, 0.0  ;;  %v1443_v51 = vsub.f32 0.0, %v1066_v24 }
  0xe8   :  { %v1076_v27 = vpop.f32.mrf.mxu0  ;;  %v1096_v34 = vpop.f32.mrf.mxu1  ;;  %v184_v36 = vsel %vm174_vm3, %v169_v33, 0.0  ;;  %v196_v46 = vsel %vm174_vm3, %v173_v43, 0.0  ;;  %v1446_v2 = vsub.f32 0.0, %v1061_v22  ;;  %v220_v3 = vmul.f32 0.2, %v212_v60 }
  0xe9   :  { %v168_v30 = vsel %vm160_vm4, %v1076_v27, 0.0  ;;  %v172_v40 = vsel %vm164_vm8, %v1096_v34, 0.0  ;;  %v227_v54 = vmul.f32 0.2, %v1443_v51  ;;  %v1448_v63 = vsub.f32 0.0, %v1076_v27 }
  0xea   :  { %v181_v32 = vsel %vm174_vm3, %v168_v30, 0.0  ;;  %v193_v44 = vsel %vm174_vm3, %v172_v40, 0.0  ;;  %v1445_v1 = vsub.f32 0.0, %v1096_v34  ;;  %v224_v4 = vmul.f32 0.2, %v1447_v61 }
  0xeb   :  { %179 = vadd.xlane.f32.xlu0 %v178_v26  ;;  %182 = vadd.xlane.f32.xlu1 %v181_v32  ;;  %v200_v35 = vadd.f32 %v199_v28, %v181_v32  ;;  %v1124_v57 = vadd.f32 1.0, %v227_v54  ;;  %v222_v6 = vmul.f32 0.2, %v1448_v63  ;;  %v223_v17 = vmul.f32 0.2, %v1446_v2 }
  0xec   :  { %v226_v8 = vmul.f32 0.2, %v1445_v1  ;;  %v228_v18 = vadd.f32 1.0, %v220_v3  ;;  %v1149_v21 = vadd.f32 1.0, %v224_v4  ;;  %v229_v23 = vadd.f32 1.0, %v221_v5 }
  0xed   :  { %v201_v39 = vadd.f32 %v200_v35, %v184_v36  ;;  %v230_v26 = vadd.f32 1.0, %v222_v6  ;;  %v1151_v28 = vadd.f32 1.0, %v225_v7  ;;  %v1155_v32 = vadd.f32 1.0, %v223_v17 }
  0xee   :  { %v1153_v30 = vadd.f32 1.0, %v226_v8 }
  0xef   :  { %188 = vadd.xlane.f32.xlu0 %v187_v38  ;;  %185 = vadd.xlane.f32.xlu1 %v184_v36  ;;  %v202_v42 = vadd.f32 %v201_v39, %v187_v38 }
  0xf1   :  { %v203_v45 = vadd.f32 %v202_v42, %v190_v41 }
  0xf3   :  { %194 = vadd.xlane.f32.xlu0 %v193_v44  ;;  %191 = vadd.xlane.f32.xlu1 %v190_v41  ;;  %v204_v47 = vadd.f32 %v203_v45, %v193_v44 }
  0xf5   :  { %v205_v48 = vadd.f32 %v204_v47, %v196_v46 }
  0xf7   :  { %197 = vadd.xlane.f32.xlu1 %v196_v46  ;;  %v206_v49 = vrot.slane %v205_v48, 4 }
  0xf9   :  { %v207_v50 = vadd.f32 %v206_v49, %v205_v48 }
  0xfb   :  { %v208_v52 = vrot.slane %v207_v50, 2 }
  0xfd   :  { %v209_v53 = vadd.f32 %v208_v52, %v207_v50 }
  0xff   :  { %v210_v55 = vrot.slane %v209_v53, 1 }
 0x101   :  { %v1122_v56 = vadd.f32 %v210_v55, %v209_v53 }
 0x103   :  { %v236_v58 = vmul.f32 0.1, %v1122_v56 }
 0x105   :  { %v1128_v59 = vadd.f32 %v236_v58, %v1124_v57  ;;  %v237_v31 = vadd.f32 %v236_v58, %v228_v18  ;;  %v238_v33 = vadd.f32 %v236_v58, %v229_v23  ;;  %v239_v35 = vadd.f32 %v236_v58, %v230_v26 }
 0x106   :  { %v241_v36 = vadd.f32 %v236_v58, %v1149_v21  ;;  %v240_v37 = vadd.f32 %v236_v58, %v1155_v32  ;;  %v243_v41 = vadd.f32 %v236_v58, %v1153_v30  ;;  %v242_v42 = vadd.f32 %v236_v58, %v1151_v28 }
 0x107   :  { %v293_v39 = vmul.f32 %v237_v31, %v237_v31  ;;  %v309_v40 = vmul.f32 2.0, %v237_v31  ;;  %v294_v45 = vmul.f32 %v238_v33, %v238_v33  ;;  %v310_v46 = vmul.f32 2.0, %v238_v33 }
 0x108   :  { %v295_v47 = vmul.f32 %v239_v35, %v239_v35  ;;  %v311_v48 = vmul.f32 2.0, %v239_v35  ;;  %v297_v49 = vmul.f32 %v241_v36, %v241_v36  ;;  %v313_v50 = vmul.f32 2.0, %v241_v36 }
 0x109   :  { %v1162_v54 = vmul.f32 %v240_v37, %v240_v37  ;;  %v1164_v55 = vmul.f32 2.0, %v240_v37  ;;  %v1166_v5 = vmul.f32 %v243_v41, %v243_v41  ;;  %v1168_v58 = vmul.f32 2.0, %v243_v41 }
 0x10a   :  { %v1170_v6 = vmul.f32 %v242_v42, %v242_v42  ;;  %v1172_v7 = vmul.f32 2.0, %v242_v42  ;;  %v1176_v37 = vmul.f32 %v1128_v59, %v1128_v59 }
 0x170   :  { %v177_v38 = vpop.xlane.xlu0 %176 }
 0x171   :  { %v245_v43 = vmul.f32 0.1, %v177_v38  ;;  %v261_v44 = vmul.f32 0.01, %v177_v38 }
 0x173   :  { %v253_v52 = vsub.f32 1.0, %v245_v43  ;;  %v269_v53 = vmul.f32 %v261_v44, %v1122_v56  ;;  %v301_v44 = vmul.f32 %v293_v39, %v177_v38 }
 0x174   :  { %v180_v3 = vpop.xlane.xlu0 %179  ;;  %v183_v4 = vpop.xlane.xlu1 %182 }
 0x175   :  { %v277_v8 = vadd.f32 %v269_v53, %v228_v18  ;;  %v317_v17 = vmul.f32 %v309_v40, %v253_v52  ;;  %v341_v31 = vmul.f32 %v253_v52, %v253_v52  ;;  %v246_v33 = vmul.f32 0.1, %v180_v3 }
 0x176   :  { %v262_v35 = vmul.f32 0.01, %v180_v3  ;;  %v247_v36 = vmul.f32 0.1, %v183_v4  ;;  %v263_v43 = vmul.f32 0.01, %v183_v4  ;;  %v302_v41 = vmul.f32 %v294_v45, %v180_v3 }
 0x177   :  { %v325_v51 = vmul.f32 %v317_v17, %v212_v60  ;;  %v254_v0 = vsub.f32 1.0, %v246_v33  ;;  %v285_v1 = vadd.f32 1e-05, %v277_v8  ;;  %v349_v53 = vmul.f32 %v341_v31, %v1122_v56 }
 0x178   :  { %v270_v2 = vmul.f32 %v262_v35, %v1122_v56  ;;  %v255_v42 = vsub.f32 1.0, %v247_v36  ;;  %v271_v18 = vmul.f32 %v263_v43, %v1122_v56  ;;  %v189_v40 = vpop.xlane.xlu0 %188  ;;  %v1456_v60 = vsub.f32 0.0, %v1031_v12  ;;  %v186_v8 = vpop.xlane.xlu1 %185 }
 0x179   :  { %v333_v52 = vadd.f32 %v325_v51, %v301_v44  ;;  %v318_v61 = vmul.f32 %v310_v46, %v254_v0  ;;  %v342_v63 = vmul.f32 %v254_v0, %v254_v0  ;;  %v303_v45 = vmul.f32 %v295_v47, %v183_v4 }
 0x17a   :  { %v278_v62 = vadd.f32 %v270_v2, %v229_v23  ;;  %v279_v29 = vadd.f32 %v271_v18, %v230_v26  ;;  %v319_v25 = vmul.f32 %v311_v48, %v255_v42  ;;  %v343_v20 = vmul.f32 %v255_v42, %v255_v42 }
 0x17b   :  { %v357_v38 = vadd.f32 %v349_v53, %v333_v52  ;;  %v326_v39 = vmul.f32 %v318_v61, %v1456_v60  ;;  %v249_v3 = vmul.f32 0.1, %v189_v40  ;;  %839 = vrcp.f32 %v285_v1 }
 0x17c   :  { %v286_v17 = vadd.f32 1e-05, %v278_v62  ;;  %v350_v33 = vmul.f32 %v342_v63, %v1122_v56  ;;  %v1457_v51 = vsub.f32 0.0, %v1076_v27  ;;  %v265_v23 = vmul.f32 0.01, %v189_v40  ;;  %v192_v52 = vpop.xlane.xlu1 %191 }
 0x17d   :  { %v1186_v46 = vmax.f32 %v357_v38, 0.0  ;;  %v334_v0 = vadd.f32 %v326_v39, %v302_v41  ;;  %v257_v2 = vsub.f32 1.0, %v249_v3  ;;  %v287_v26 = vadd.f32 1e-05, %v279_v29 }
 0x17e   :  { %v327_v31 = vmul.f32 %v319_v25, %v1457_v51  ;;  %v351_v12 = vmul.f32 %v343_v20, %v1122_v56  ;;  %v248_v61 = vmul.f32 0.1, %v186_v8  ;;  %v273_v62 = vmul.f32 %v265_v23, %v1122_v56  ;;  %v195_v20 = vpop.xlane.xlu0 %194 }
 0x17f   :  { %841 = vrsqrt.f32 %v1186_v46  ;;  %v358_v47 = vadd.f32 %v350_v33, %v334_v0  ;;  %v321_v1 = vmul.f32 %v313_v50, %v257_v2  ;;  %v305_v4 = vmul.f32 %v297_v49, %v189_v40 }
 0x180   :  { %v335_v48 = vadd.f32 %v327_v31, %v303_v45  ;;  %v345_v27 = vmul.f32 %v257_v2, %v257_v2  ;;  %v256_v25 = vsub.f32 1.0, %v248_v61  ;;  %v281_v36 = vadd.f32 %v273_v62, %v1149_v21 }
 0x181   :  { %v1191_v35 = vmax.f32 %v358_v47, 0.0  ;;  %v1458_v29 = vsub.f32 0.0, %v1052_v19  ;;  %v264_v44 = vmul.f32 0.01, %v186_v8  ;;  %843 = vrcp.f32 %v286_v17 }
 0x182   :  { %v359_v63 = vadd.f32 %v351_v12, %v335_v48  ;;  %v353_v42 = vmul.f32 %v345_v27, %v1122_v56  ;;  %v320_v50 = vmul.f32 %v1164_v55, %v256_v25  ;;  %v289_v49 = vadd.f32 1e-05, %v281_v36  ;;  %v198_v48 = vpop.xlane.xlu1 %197 }
 0x183   :  { %v329_v43 = vmul.f32 %v321_v1, %v1458_v29  ;;  %845 = vrsqrt.f32 %v1191_v35  ;;  %v272_v40 = vmul.f32 %v264_v44, %v1122_v56  ;;  %v304_v21 = vmul.f32 %v1162_v54, %v186_v8 }
 0x184   :  { %v1196_v41 = vmax.f32 %v359_v63, 0.0  ;;  %v1459_v19 = vsub.f32 0.0, %v1061_v22  ;;  %v344_v38 = vmul.f32 %v256_v25, %v256_v25  ;;  %v251_v60 = vmul.f32 0.1, %v195_v20 }
 0x185   :  { %v337_v18 = vadd.f32 %v329_v43, %v305_v4  ;;  %v280_v45 = vadd.f32 %v272_v40, %v1155_v32  ;;  %v267_v55 = vmul.f32 0.01, %v195_v20  ;;  %v250_v22 = vmul.f32 0.1, %v192_v52 }
 0x186   :  { %v328_v53 = vmul.f32 %v320_v50, %v1459_v19  ;;  %847 = vrsqrt.f32 %v1196_v41  ;;  %v352_v17 = vmul.f32 %v344_v38, %v1122_v56  ;;  %v259_v33 = vsub.f32 1.0, %v251_v60 }
 0x187   :  { %v361_v39 = vadd.f32 %v353_v42, %v337_v18  ;;  %849 = vrcp.f32 %v287_v26  ;;  %v275_v54 = vmul.f32 %v267_v55, %v1122_v56  ;;  %v266_v2 = vmul.f32 0.01, %v192_v52 }
 0x188   :  { %v336_v3 = vadd.f32 %v328_v53, %v304_v21  ;;  %851 = vrcp.f32 %v289_v49  ;;  %v323_v31 = vmul.f32 %v1168_v58, %v259_v33  ;;  %v347_v0 = vmul.f32 %v259_v33, %v259_v33  ;;  %v840_v23 = vpop.eup %839 }
 0x189   :  { %v1208_v51 = vmax.f32 %v361_v39, 0.0  ;;  %v288_v32 = vadd.f32 1e-05, %v280_v45  ;;  %v258_v26 = vsub.f32 1.0, %v250_v22  ;;  %v316_v12 = vmul.f32 2.0, %v1128_v59 }
 0x18a   :  { %v360_v8 = vadd.f32 %v352_v17, %v336_v3  ;;  %v283_v47 = vadd.f32 %v275_v54, %v1153_v30  ;;  %v307_v62 = vmul.f32 %v1166_v5, %v195_v20  ;;  %v1460_v1 = vsub.f32 0.0, %v1096_v34 }
 0x18b   :  { %853 = vrsqrt.f32 %v1208_v51  ;;  %v355_v58 = vmul.f32 %v347_v0, %v1122_v56  ;;  %v274_v4 = vmul.f32 %v266_v2, %v1122_v56  ;;  %v322_v27 = vmul.f32 %v1172_v7, %v258_v26 }
 0x18c   :  { %v1214_v61 = vmax.f32 %v360_v8, 0.0  ;;  %v331_v63 = vmul.f32 %v323_v31, %v1460_v1  ;;  %v346_v25 = vmul.f32 %v258_v26, %v258_v26  ;;  %v842_v36 = vpop.eup %841  ;;  %v252_v29 = vmul.f32 0.1, %v198_v48 }
 0x18d   :  { %v268_v43 = vmul.f32 0.01, %v198_v48  ;;  %v282_v30 = vadd.f32 %v274_v4, %v1151_v28  ;;  %v306_v5 = vmul.f32 %v1170_v6, %v192_v52  ;;  %v1461_v34 = vsub.f32 0.0, %v1038_v14 }
 0x18e   :  { %855 = vrsqrt.f32 %v1214_v61  ;;  %v339_v59 = vadd.f32 %v331_v63, %v307_v62  ;;  %v1228_v20 = vadd.f32 1e-05, %v283_v47  ;;  %v260_v50 = vsub.f32 1.0, %v252_v29  ;;  %v844_v49 = vpop.eup %843 }
 0x18f   :  { %857 = vrcp.f32 %v288_v32  ;;  %v330_v44 = vmul.f32 %v322_v27, %v1461_v34  ;;  %v276_v7 = vmul.f32 %v268_v43, %v1122_v56  ;;  %v354_v40 = vmul.f32 %v346_v25, %v1122_v56 }
 0x190   :  { %v363_v42 = vadd.f32 %v355_v58, %v339_v59  ;;  %v374_v21 = vmul.f32 %v842_v36, %v1186_v46  ;;  %vm375_vm10 = vcmp.eq.f32.partialorder %v1186_v46, inf  ;;  %v846_v28 = vpop.eup %845  ;;  %v324_v6 = vmul.f32 %v316_v12, %v260_v50 }
 0x191   :  { %v338_v18 = vadd.f32 %v330_v44, %v306_v5  ;;  %v284_v14 = vadd.f32 %v276_v7, %v1124_v57  ;;  %v348_v52 = vmul.f32 %v260_v50, %v260_v50  ;;  %v290_v53 = vadd.f32 1e-05, %v282_v30 }
 0x192   :  { %v1234_v19 = vmax.f32 %v363_v42, 0.0  ;;  %v308_v60 = vmul.f32 %v1176_v37, %v198_v48  ;;  %v376_v39 = vsel %vm375_vm10, %v1186_v46, %v374_v21  ;;  %v1462_v3 = vsub.f32 0.0, %v1066_v24 }
 0x193   :  { %v362_v38 = vadd.f32 %v354_v40, %v338_v18  ;;  %v848_v45 = vpop.eup %847  ;;  %v292_v55 = vadd.f32 1e-05, %v284_v14  ;;  %vm377_vm11 = vcmp.eq.f32.partialorder %v1186_v46, 0.0  ;;  %v356_v57 = vmul.f32 %v348_v52, %v1122_v56 }
 0x194   :  { %859 = vrsqrt.f32 %v1234_v19  ;;  %v332_v17 = vmul.f32 %v324_v6, %v1462_v3  ;;  %v850_v33 = vpop.eup %849  ;;  %v378_v22 = vand.u32 2147483648, %v1186_v46  ;;  %v381_v37 = vmul.f32 %v846_v28, %v1191_v35 }
 0x195   :  { %v1243_v54 = vmax.f32 %v362_v38, 0.0  ;;  %v852_v8 = vpop.eup %851  ;;  %vm382_vm12 = vcmp.eq.f32.partialorder %v1191_v35, inf  ;;  %vm384_vm13 = vcmp.eq.f32.partialorder %v1191_v35, 0.0  ;;  %v385_v24 = vand.u32 2147483648, %v1191_v35 }
 0x196   :  { %v340_v31 = vadd.f32 %v332_v17, %v308_v60  ;;  %v379_v0 = vsel %vm377_vm11, %v378_v22, %v376_v39  ;;  %v383_v2 = vsel %vm382_vm12, %v1191_v35, %v381_v37  ;;  %v388_v32 = vmul.f32 %v848_v45, %v1196_v41 }
 0x197   :  { %861 = vrsqrt.f32 %v1243_v54  ;;  %v430_v46 = vmul.f32 %v840_v23, %v379_v0  ;;  %v386_v48 = vsel %vm384_vm13, %v385_v24, %v383_v2  ;;  %vm389_vm14 = vcmp.eq.f32.partialorder %v1196_v41, inf }
 0x198   :  { %v854_v56 = vpop.eup %853  ;;  %v364_v26 = vadd.f32 %v356_v57, %v340_v31  ;;  %863 = vrcp.f32 %v290_v53  ;;  %v432_v12 = vmul.f32 %v844_v49, %v386_v48  ;;  %v390_v47 = vsel %vm389_vm14, %v1196_v41, %v388_v32 }
 0x199   :  { %v392_v62 = vand.u32 2147483648, %v1196_v41  ;;  %865 = vrcp.f32 %v292_v55  ;;  %v445_v63 = vmul.f32 0.31622776, %v430_v46  ;;  %vm391_vm15 = vcmp.eq.f32.partialorder %v1196_v41, 0.0 }
 0x19a   :  { %v1257_v1 = vmax.f32 %v364_v26, 0.0  ;;  %v446_v58 = vmul.f32 0.31622776, %v432_v12  ;;  %vm396_vm10 = vcmp.eq.f32.partialorder %v1214_v61, inf  ;;  %v402_v23 = vmul.f32 %v854_v56, %v1208_v51 }
 0x19b   :  { %v856_v35 = vpop.eup %855  ;;  %v393_v4 = vsel %vm391_vm15, %v392_v62, %v390_v47  ;;  %v453_v25 = vmin.f32 %v445_v63, 0.99999  ;;  %vm398_vm11 = vcmp.eq.f32.partialorder %v1214_v61, 0.0  ;;  %v399_v43 = vand.u32 2147483648, %v1214_v61 }
 0x19c   :  { %v858_v27 = vpop.eup %857  ;;  %867 = vrsqrt.f32 %v1257_v1  ;;  %v434_v36 = vmul.f32 %v850_v33, %v393_v4  ;;  %v395_v59 = vmul.f32 %v856_v35, %v1214_v61  ;;  %v454_v29 = vmin.f32 %v446_v58, 0.99999 }
 0x19d   :  { %vm403_vm12 = vcmp.eq.f32.partialorder %v1208_v51, inf  ;;  %v469_v41 = vsub.f32 1.0, %v453_v25  ;;  %v406_v34 = vand.u32 2147483648, %v1208_v51  ;;  %vm405_vm13 = vcmp.eq.f32.partialorder %v1208_v51, 0.0 }
 0x19e   :  { %v447_v30 = vmul.f32 0.31622776, %v434_v36  ;;  %v397_v5 = vsel %vm396_vm10, %v1214_v61, %v395_v59  ;;  %v470_v44 = vsub.f32 1.0, %v454_v29  ;;  %v404_v50 = vsel %vm403_vm12, %v1208_v51, %v402_v23 }
 0x19f   :  { %v400_v42 = vsel %vm398_vm11, %v399_v43, %v397_v5  ;;  %869 = vrcp.f32 %v469_v41  ;;  %v407_v18 = vsel %vm405_vm13, %v406_v34, %v404_v50  ;;  %vm410_vm14 = vcmp.eq.f32.partialorder %v1243_v54, inf }
 0x1a0   :  { %v455_v7 = vmin.f32 %v447_v30, 0.99999  ;;  %v436_v49 = vmul.f32 %v858_v27, %v400_v42  ;;  %871 = vrcp.f32 %v470_v44  ;;  %v438_v14 = vmul.f32 %v852_v8, %v407_v18 }
 0x1a1   :  { %v860_v40 = vpop.eup %859  ;;  %873 = vrcp.f32 %v1228_v20  ;;  %v413_v60 = vand.u32 2147483648, %v1243_v54  ;;  %vm412_vm15 = vcmp.eq.f32.partialorder %v1243_v54, 0.0  ;;  %vm417_vm10 = vcmp.eq.f32.partialorder %v1234_v19, inf }
 0x1a2   :  { %v471_v21 = vsub.f32 1.0, %v455_v7  ;;  %v448_v28 = vmul.f32 0.31622776, %v436_v49  ;;  %v449_v38 = vmul.f32 0.31622776, %v438_v14  ;;  %v416_v39 = vmul.f32 %v860_v40, %v1234_v19 }
 0x1a3   :  { %v420_v8 = vand.u32 2147483648, %v1234_v19  ;;  %vm424_vm11 = vcmp.eq.f32.partialorder %v1257_v1, inf  ;;  %v427_v31 = vand.u32 2147483648, %v1257_v1  ;;  %v461_v24 = vadd.f32 1.0, %v453_v25 }
 0x1a4   :  { %v862_v61 = vpop.eup %861  ;;  %875 = vrcp.f32 %v471_v21  ;;  %v456_v6 = vmin.f32 %v448_v28, 0.99999  ;;  %v457_v33 = vmin.f32 %v449_v38, 0.99999  ;;  %v418_v57 = vsel %vm417_vm10, %v1234_v19, %v416_v39 }
 0x1a5   :  { %v409_v52 = vmul.f32 %v862_v61, %v1243_v54  ;;  %v864_v53 = vpop.eup %863  ;;  %vm419_vm12 = vcmp.eq.f32.partialorder %v1234_v19, 0.0  ;;  %vm426_vm13 = vcmp.eq.f32.partialorder %v1257_v1, 0.0  ;;  %v462_v2 = vadd.f32 1.0, %v454_v29 }
 0x1a6   :  { %v472_v51 = vsub.f32 1.0, %v456_v6  ;;  %v866_v45 = vpop.eup %865  ;;  %v421_v32 = vsel %vm419_vm12, %v420_v8, %v418_v57  ;;  %v473_v48 = vsub.f32 1.0, %v457_v33  ;;  %v463_v35 = vadd.f32 1.0, %v455_v7 }
 0x1a7   :  { %v411_v20 = vsel %vm410_vm14, %v1243_v54, %v409_v52  ;;  %v464_v23 = vadd.f32 1.0, %v456_v6  ;;  %v465_v42 = vadd.f32 1.0, %v457_v33 }
 0x1a8   :  { %877 = vrcp.f32 %v472_v51  ;;  %v414_v55 = vsel %vm412_vm15, %v413_v60, %v411_v20 }
 0x1a9   :  { %v868_v3 = vpop.eup %867  ;;  %v440_v17 = vmul.f32 %v864_v53, %v414_v55 }
 0x1aa   :  { %v423_v22 = vmul.f32 %v868_v3, %v1257_v1 }
 0x1ab   :  { %v450_v37 = vmul.f32 0.31622776, %v440_v17 }
 0x1ac   :  { %v425_v54 = vsel %vm424_vm11, %v1257_v1, %v423_v22  ;;  %v870_v0 = vpop.eup %869 }
 0x1ad   :  { %v428_v56 = vsel %vm426_vm13, %v427_v31, %v425_v54  ;;  %v872_v26 = vpop.eup %871  ;;  %v485_v46 = vmul.f32 %v870_v0, %v461_v24  ;;  %v458_v12 = vmin.f32 %v450_v37, 0.99999 }
 0x1ae   :  { %v1287_v47 = vmul.f32 %v866_v45, %v428_v56  ;;  %v874_v62 = vpop.eup %873  ;;  %v486_v63 = vmul.f32 %v872_v26, %v462_v2 }
 0x1af   :  { %879 = vlog2.f32 %v485_v46  ;;  %v442_v58 = vmul.f32 %v874_v62, %v421_v32  ;;  %v474_v1 = vsub.f32 1.0, %v458_v12  ;;  %v466_v6 = vadd.f32 1.0, %v458_v12 }
 0x1b0   :  { %881 = vlog2.f32 %v486_v63 }
 0x1b1   :  { %v876_v19 = vpop.eup %875  ;;  %883 = vrcp.f32 %v473_v48  ;;  %v451_v27 = vmul.f32 0.31622776, %v442_v58 }
 0x1b2   :  { %v487_v4 = vmul.f32 %v876_v19, %v463_v35 }
 0x1b3   :  { %v459_v59 = vmin.f32 %v451_v27, 0.99999 }
 0x1b4   :  { %885 = vlog2.f32 %v487_v4 }
 0x1b5   :  { %v878_v25 = vpop.eup %877  ;;  %887 = vrcp.f32 %v474_v1  ;;  %v475_v29 = vsub.f32 1.0, %v459_v59  ;;  %v467_v57 = vadd.f32 1.0, %v459_v59 }
 0x1b6   :  { %v488_v36 = vmul.f32 %v878_v25, %v464_v23 }
 0x1b8   :  { %889 = vlog2.f32 %v488_v36 }
 0x1b9   :  { %891 = vrcp.f32 %v475_v29 }
 0x1bc   :  { %v880_v43 = vpop.eup %879 }
 0x1bd   :  { %v882_v41 = vpop.eup %881  ;;  %v494_v30 = vmul.f32 0.6931472, %v880_v43 }
 0x1be   :  { %v884_v5 = vpop.eup %883  ;;  %v496_v34 = vmul.f32 0.6931472, %v882_v41  ;;  %v452_v41 = vmul.f32 0.31622776, %v1287_v47 }
 0x1bf   :  { %v509_v44 = vmul.f32 0.5, %v494_v30  ;;  %v489_v40 = vmul.f32 %v884_v5, %v465_v42 }
 0x1c0   :  { %v510_v7 = vmul.f32 0.5, %v496_v34  ;;  %v460_v30 = vmin.f32 %v452_v41, 0.99999 }
 0x1c1   :  { %v886_v50 = vpop.eup %885  ;;  %v517_v49 = vmul.f32 -6.3245554, %v509_v44  ;;  %893 = vlog2.f32 %v489_v40 }
 0x1c2   :  { %v498_v18 = vmul.f32 0.6931472, %v886_v50  ;;  %v888_v21 = vpop.eup %887  ;;  %v518_v28 = vmul.f32 -6.3245554, %v510_v7  ;;  %v476_v5 = vsub.f32 1.0, %v460_v30  ;;  %v468_v44 = vadd.f32 1.0, %v460_v30 }
 0x1c3   :  { %v525_v14 = vmul.f32 5.0, %v517_v49  ;;  %v490_v60 = vmul.f32 %v888_v21, %v466_v6 }
 0x1c4   :  { %v511_v61 = vmul.f32 0.5, %v498_v18  ;;  %v526_v53 = vmul.f32 5.0, %v518_v28 }
 0x1c5   :  { %v890_v52 = vpop.eup %889  ;;  %545 = vrot.lane.b32.xlu0 %v525_v14, %s945_s0  ;;  %895 = vlog2.f32 %v490_v60  ;;  %v533_v33 = vsel %vm158_vm2, -1e+09, %v525_v14 }
 0x1c6   :  { %v519_v51 = vmul.f32 -6.3245554, %v511_v61  ;;  %v500_v38 = vmul.f32 0.6931472, %v890_v52  ;;  %547 = vrot.lane.b32.xlu1 %v526_v53, %s945_s0  ;;  %v534_v20 = vsel %vm159_vm1, -1e+09, %v526_v53  ;;  %v892_v17 = vpop.eup %891 }
 0x1c7   :  { %v491_v22 = vmul.f32 %v892_v17, %v467_v57 }
 0x1c8   :  { %v527_v39 = vmul.f32 5.0, %v519_v51  ;;  %v512_v45 = vmul.f32 0.5, %v500_v38 }
 0x1c9   :  { %897 = vlog2.f32 %v491_v22 }
 0x1ca   :  { %549 = vrot.lane.b32.xlu0 %v527_v39, %s945_s0  ;;  %v520_v55 = vmul.f32 -6.3245554, %v512_v45  ;;  %563 = vrot.lane.b32.xlu1 %v534_v20, %s946_s22  ;;  %v535_v37 = vsel %vm160_vm4, -1e+09, %v527_v39  ;;  %899 = vrcp.f32 %v476_v5 }
 0x1cc   :  { %v528_v3 = vmul.f32 5.0, %v520_v55 }
 0x1ce   :  { %551 = vrot.lane.b32.xlu0 %v528_v3, %s945_s0  ;;  %561 = vrot.lane.b32.xlu1 %v533_v33, %s946_s22  ;;  %v894_v8 = vpop.eup %893  ;;  %v536_v31 = vsel %vm161_vm6, -1e+09, %v528_v3 }
 0x1cf   :  { %v502_v24 = vmul.f32 0.6931472, %v894_v8 }
 0x1d1   :  { %v513_v0 = vmul.f32 0.5, %v502_v24 }
 0x1d2   :  { %565 = vrot.lane.b32.xlu1 %v535_v37, %s946_s22  ;;  %v896_v54 = vpop.eup %895 }
 0x1d3   :  { %v504_v2 = vmul.f32 0.6931472, %v896_v54  ;;  %v521_v32 = vmul.f32 -6.3245554, %v513_v0 }
 0x1d5   :  { %v514_v56 = vmul.f32 0.5, %v504_v2  ;;  %v1301_v46 = vmul.f32 5.0, %v521_v32 }
 0x1d6   :  { %567 = vrot.lane.b32.xlu1 %v536_v31, %s946_s22  ;;  %v898_v26 = vpop.eup %897 }
 0x1d7   :  { %v522_v48 = vmul.f32 -6.3245554, %v514_v56  ;;  %v506_v12 = vmul.f32 0.6931472, %v898_v26  ;;  %v537_v62 = vsel %vm162_vm5, -1e+09, %v1301_v46  ;;  %v900_v34 = vpop.eup %899 }
 0x1d8   :  { %v649_v58 = vsel %vm17_vm0, %v1301_v46, %v537_v62  ;;  %v492_v42 = vmul.f32 %v900_v34, %v468_v44 }
 0x1d9   :  { %v1307_v63 = vmul.f32 5.0, %v522_v48  ;;  %v515_v35 = vmul.f32 0.5, %v506_v12  ;;  %v653_v1 = vsel %vm174_vm3, %v649_v58, -inf }
 0x1da   :  { %901 = vlog2.f32 %v492_v42 }
 0x1db   :  { %v538_v4 = vsel %vm163_vm7, -1e+09, %v1307_v63  ;;  %v523_v23 = vmul.f32 -6.3245554, %v515_v35 }
 0x1dc   :  { %v650_v27 = vsel %vm17_vm0, %v1307_v63, %v538_v4 }
 0x1dd   :  { %v656_v15 = vsel %vm174_vm3, %v650_v27, -inf  ;;  %v1319_v25 = vmul.f32 5.0, %v523_v23 }
 0x1df   :  { %v539_v59 = vsel %vm164_vm8, -1e+09, %v1319_v25 }
 0x1e0   :  { %v651_v29 = vsel %vm17_vm0, %v1319_v25, %v539_v59 }
 0x1e1   :  { %v659_v43 = vsel %vm174_vm3, %v651_v29, -inf }
 0x1e7   :  { %v902_v50 = vpop.eup %901 }
 0x1e8   :  { %v508_v7 = vmul.f32 0.6931472, %v902_v50 }
 0x1ea   :  { %v516_v49 = vmul.f32 0.5, %v508_v7 }
 0x1ec   :  { %v524_v18 = vmul.f32 -6.3245554, %v516_v49 }
 0x1ed   :  { %654 = vmax.xlane.f32.xlu0 %v653_v1 }
 0x1ee   :  { %v1331_v21 = vmul.f32 5.0, %v524_v18 }
 0x1f0   :  { %v540_v61 = vsel %vm165_vm9, -1e+09, %v1331_v21 }
 0x1f1   :  { %657 = vmax.xlane.f32.xlu0 %v656_v15  ;;  %v652_v53 = vsel %vm17_vm0, %v1331_v21, %v540_v61 }
 0x1f2   :  { %v662_v39 = vsel %vm174_vm3, %v652_v53, -inf }
 0x1fa   :  { %660 = vmax.xlane.f32.xlu1 %v659_v43 }
 0x237   :  { %v1333_v28 = vpop.permute.xlu0 %545 }
 0x238   :  { %v1329_v40 = vpop.permute.xlu1 %547 }
 0x239   :  { %v626_v47 = vsel %vm159_vm1, %v1329_v40, 0.0 }
 0x23c   :  { %v564_v14 = vpop.permute.xlu1 %563  ;;  %v1346_v60 = vpop.permute.xlu0 %549 }
 0x23d   :  { %v574_v6 = vsel %vm17_vm0, %v1329_v40, %v564_v14  ;;  %v625_v40 = vsel %vm158_vm2, %v1333_v28, 0.0 }
 0x23e   :  { %v580_v52 = vsel %vm174_vm3, %v574_v6, -inf  ;;  %v629_v11 = vsel %vm17_vm0, %v625_v40, 0.0 }
 0x23f   :  { %581 = vmax.xlane.f32.xlu1 %v580_v52  ;;  %v632_v52 = vsel %vm17_vm0, %v626_v47, 0.0 }
 0x240   :  { %v562_v51 = vpop.permute.xlu1 %561  ;;  %v1353_v17 = vpop.permute.xlu0 %551 }
 0x241   :  { %v573_v38 = vsel %vm17_vm0, %v1333_v28, %v562_v51  ;;  %v704_v28 = vsel %vm161_vm6, %v1331_v21, 0.0 }
 0x242   :  { %v577_v45 = vsel %vm174_vm3, %v573_v38, -inf }
 0x243   :  { %663 = vmax.xlane.f32.xlu1 %v662_v39  ;;  %578 = vmax.xlane.f32.xlu0 %v577_v45  ;;  %v703_v45 = vsel %vm160_vm4, %v1319_v25, 0.0  ;;  %v714_v25 = vsel %vm17_vm0, %v704_v28, 0.0 }
 0x244   :  { %v566_v20 = vpop.permute.xlu1 %565 }
 0x245   :  { %v575_v55 = vsel %vm17_vm0, %v1346_v60, %v566_v20  ;;  %v701_v20 = vsel %vm158_vm2, %v1301_v46, 0.0  ;;  %v628_v46 = vsel %vm161_vm6, %v1353_v17, 0.0 }
 0x246   :  { %v583_v3 = vsel %vm174_vm3, %v575_v55, -inf  ;;  %v638_v21 = vsel %vm17_vm0, %v628_v46, 0.0 }
 0x247   :  { %584 = vmax.xlane.f32.xlu0 %v583_v3  ;;  %v627_v3 = vsel %vm160_vm4, %v1346_v60, 0.0 }
 0x248   :  { %v568_v33 = vpop.permute.xlu1 %567  ;;  %v635_v9 = vsel %vm17_vm0, %v627_v3, 0.0 }
 0x249   :  { %v576_v57 = vsel %vm17_vm0, %v1353_v17, %v568_v33 }
 0x24a   :  { %v586_v22 = vsel %vm174_vm3, %v576_v57, -inf }
 0x24b   :  { %587 = vmax.xlane.f32.xlu0 %v586_v22 }
 0x276   :  { %v1358_v37 = vpop.xlane.xlu0 %654 }
 0x277   :  { %v665_v8 = vsub.f32 %v649_v58, %v1358_v37 }
 0x279   :  { %v669_v31 = vmul.f32 1.442695, %v665_v8 }
 0x27a   :  { %v1361_v24 = vpop.xlane.xlu0 %657 }
 0x27b   :  { %903 = vpow2.f32 %v669_v31  ;;  %v666_v54 = vsub.f32 %v650_v27, %v1361_v24 }
 0x27d   :  { %v671_v0 = vmul.f32 1.442695, %v666_v54 }
 0x27f   :  { %905 = vpow2.f32 %v671_v0 }
 0x283   :  { %v1364_v2 = vpop.xlane.xlu1 %660 }
 0x284   :  { %v667_v32 = vsub.f32 %v651_v29, %v1364_v2 }
 0x286   :  { %v673_v56 = vmul.f32 1.442695, %v667_v32 }
 0x288   :  { %v904_v26 = vpop.eup %903  ;;  %907 = vpow2.f32 %v673_v56 }
 0x289   :  { %v677_v48 = vsel %vm174_vm3, %v904_v26, 0.0 }
 0x28a   :  { %678 = vadd.xlane.f32.xlu0 %v677_v48 }
 0x28c   :  { %v906_v12 = vpop.eup %905 }
 0x28d   :  { %v680_v62 = vsel %vm174_vm3, %v906_v12, 0.0 }
 0x28e   :  { %681 = vadd.xlane.f32.xlu1 %v680_v62 }
 0x295   :  { %v908_v35 = vpop.eup %907 }
 0x296   :  { %v683_v58 = vsel %vm174_vm3, %v908_v35, 0.0 }
 0x297   :  { %684 = vadd.xlane.f32.xlu1 %v683_v58 }
 0x2c8   :  { %v1370_v19 = vpop.xlane.xlu1 %581 }
 0x2c9   :  { %v590_v4 = vsub.f32 %v574_v6, %v1370_v19 }
 0x2cb   :  { %v595_v1 = vmul.f32 1.442695, %v590_v4 }
 0x2cc   :  { %v1373_v23 = vpop.xlane.xlu0 %578  ;;  %v1375_v27 = vpop.xlane.xlu1 %663 }
 0x2cd   :  { %909 = vpow2.f32 %v595_v1  ;;  %v589_v15 = vsub.f32 %v573_v38, %v1373_v23  ;;  %v668_v36 = vsub.f32 %v652_v53, %v1375_v27  ;;  %v702_v53 = vsel %vm159_vm1, %v1307_v63, 0.0 }
 0x2ce   :  { %v708_v39 = vsel %vm17_vm0, %v702_v53, 0.0  ;;  %v711_v63 = vsel %vm17_vm0, %v703_v45, 0.0 }
 0x2cf   :  { %v593_v59 = vmul.f32 1.442695, %v589_v15  ;;  %v675_v29 = vmul.f32 1.442695, %v668_v36 }
 0x2d0   :  { %v1379_v43 = vpop.xlane.xlu0 %584 }
 0x2d1   :  { %911 = vpow2.f32 %v593_v59  ;;  %v591_v41 = vsub.f32 %v575_v55, %v1379_v43  ;;  %v705_v55 = vsel %vm17_vm0, %v701_v20, 0.0  ;;  %vm725_vm0 = vcmask 7168  }
 0x2d2   :  { %913 = vpow2.f32 %v675_v29 }
 0x2d3   :  { %v597_v30 = vmul.f32 1.442695, %v591_v41 }
 0x2d4   :  { %v1382_v5 = vpop.xlane.xlu0 %587 }
 0x2d5   :  { %915 = vpow2.f32 %v597_v30  ;;  %v592_v34 = vsub.f32 %v576_v57, %v1382_v5 }
 0x2d7   :  { %v599_v44 = vmul.f32 1.442695, %v592_v34 }
 0x2d9   :  { %917 = vpow2.f32 %v599_v44 }
 0x2da   :  { %v910_v42 = vpop.eup %909 }
 0x2db   :  { %v604_v50 = vsel %vm174_vm3, %v910_v42, 0.0 }
 0x2dc   :  { %605 = vadd.xlane.f32.xlu1 %v604_v50 }
 0x2de   :  { %v912_v7 = vpop.eup %911 }
 0x2df   :  { %v914_v49 = vpop.eup %913  ;;  %v601_v18 = vsel %vm174_vm3, %v912_v7, 0.0 }
 0x2e0   :  { %602 = vadd.xlane.f32.xlu0 %v601_v18  ;;  %v686_v14 = vsel %vm174_vm3, %v914_v49, 0.0 }
 0x2e1   :  { %687 = vadd.xlane.f32.xlu1 %v686_v14 }
 0x2e2   :  { %v916_v61 = vpop.eup %915 }
 0x2e3   :  { %v607_v6 = vsel %vm174_vm3, %v916_v61, 0.0 }
 0x2e4   :  { %608 = vadd.xlane.f32.xlu0 %v607_v6 }
 0x2e5   :  { %633 = vadd.xlane.f32.xlu1 %v632_v52 }
 0x2e6   :  { %v918_v51 = vpop.eup %917 }
 0x2e7   :  { %v610_v38 = vsel %vm174_vm3, %v918_v51, 0.0 }
 0x2e8   :  { %611 = vadd.xlane.f32.xlu0 %v610_v38 }
 0x2e9   :  { %709 = vadd.xlane.f32.xlu1 %v708_v39 }
 0x2ec   :  { %630 = vadd.xlane.f32.xlu0 %v629_v11 }
 0x2ed   :  { %712 = vadd.xlane.f32.xlu1 %v711_v63 }
 0x2f0   :  { %706 = vadd.xlane.f32.xlu0 %v705_v55 }
 0x2f1   :  { %715 = vadd.xlane.f32.xlu1 %v714_v25 }
 0x2f4   :  { %636 = vadd.xlane.f32.xlu0 %v635_v9 }
 0x2f8   :  { %639 = vadd.xlane.f32.xlu0 %v638_v21 }
 0x313   :  { %v679_v22 = vpop.xlane.xlu0 %678 }
 0x314   :  { %919 = vlog2.f32 %v679_v22 }
 0x317   :  { %v682_v33 = vpop.xlane.xlu1 %681 }
 0x320   :  { %v685_v57 = vpop.xlane.xlu1 %684 }
 0x321   :  { %v920_v16 = vpop.eup %919 }
 0x322   :  { %v690_v48 = vmul.f32 0.6931472, %v920_v16 }
 0x324   :  { %v697_v29 = vadd.f32 %v690_v48, %v1358_v37 }
 0x365   :  { %v606_v8 = vpop.xlane.xlu1 %605 }
 0x366   :  { %921 = vlog2.f32 %v606_v8 }
 0x367   :  { %923 = vlog2.f32 %v682_v33 }
 0x368   :  { %925 = vlog2.f32 %v685_v57 }
 0x369   :  { %v603_v13 = vpop.xlane.xlu0 %602 }
 0x36a   :  { %927 = vlog2.f32 %v603_v13  ;;  %v688_v60 = vpop.xlane.xlu1 %687 }
 0x36b   :  { %929 = vlog2.f32 %v688_v60 }
 0x36d   :  { %v609_v31 = vpop.xlane.xlu0 %608 }
 0x36e   :  { %931 = vlog2.f32 %v609_v31  ;;  %v634_v54 = vpop.xlane.xlu1 %633 }
 0x371   :  { %v612_v10 = vpop.xlane.xlu0 %611 }
 0x372   :  { %933 = vlog2.f32 %v612_v10  ;;  %v710_v12 = vpop.xlane.xlu1 %709 }
 0x373   :  { %v922_v17 = vpop.eup %921 }
 0x374   :  { %v924_v0 = vpop.eup %923  ;;  %v616_v32 = vmul.f32 0.6931472, %v922_v17 }
 0x375   :  { %v631_v56 = vpop.xlane.xlu0 %630  ;;  %v926_v26 = vpop.eup %925  ;;  %v692_v35 = vmul.f32 0.6931472, %v924_v0 }
 0x376   :  { %v622_v58 = vadd.f32 %v616_v32, %v1370_v19  ;;  %v694_v15 = vmul.f32 0.6931472, %v926_v26  ;;  %v713_v7 = vpop.xlane.xlu1 %712 }
 0x377   :  { %v928_v62 = vpop.eup %927  ;;  %v698_v34 = vadd.f32 %v692_v35, %v1361_v24 }
 0x378   :  { %v614_v4 = vmul.f32 0.6931472, %v928_v62  ;;  %v930_v1 = vpop.eup %929  ;;  %v642_v30 = vsub.f32 %v622_v58, %v634_v54  ;;  %v699_v18 = vadd.f32 %v694_v15, %v1364_v2 }
 0x379   :  { %v707_v36 = vpop.xlane.xlu0 %706  ;;  %v696_v44 = vmul.f32 0.6931472, %v930_v1  ;;  %v718_v14 = vsub.f32 %v698_v34, %v710_v12 }
 0x37a   :  { %v621_v59 = vadd.f32 %v614_v4, %v1373_v23  ;;  %v717_v49 = vsub.f32 %v697_v29, %v707_v36  ;;  %v719_v23 = vsub.f32 %v699_v18, %v713_v7  ;;  %v716_v40 = vpop.xlane.xlu1 %715 }
 0x37b   :  { %v932_v41 = vpop.eup %931  ;;  %v722_v37 = vadd.f32 %v718_v14, %v642_v30  ;;  %v700_v53 = vadd.f32 %v696_v44, %v1375_v27 }
 0x37c   :  { %v618_v42 = vmul.f32 0.6931472, %v932_v41  ;;  %v641_v50 = vsub.f32 %v621_v59, %v631_v56 }
 0x37d   :  { %v637_v19 = vpop.xlane.xlu0 %636  ;;  %v727_v2 = vsel %vm725_vm0, %v722_v37, 0.0  ;;  %v720_v11 = vsub.f32 %v700_v53, %v716_v40 }
 0x37e   :  { %v721_v47 = vadd.f32 %v717_v49, %v641_v50  ;;  %v623_v61 = vadd.f32 %v618_v42, %v1379_v43 }
 0x37f   :  { %v934_v6 = vpop.eup %933 }
 0x380   :  { %v620_v52 = vmul.f32 0.6931472, %v934_v6  ;;  %v643_v51 = vsub.f32 %v623_v61, %v637_v19  ;;  %v726_v24 = vsel %vm725_vm0, %v721_v47, 0.0 }
 0x381   :  { %v640_v45 = vpop.xlane.xlu0 %639  ;;  %v728_v28 = vadd.f32 %v727_v2, %v726_v24 }
 0x382   :  { %v723_v38 = vadd.f32 %v719_v23, %v643_v51  ;;  %v624_v39 = vadd.f32 %v620_v52, %v1382_v5 }
 0x384   :  { %v644_v63 = vsub.f32 %v624_v39, %v640_v45  ;;  %v729_v20 = vsel %vm725_vm0, %v723_v38, 0.0 }
 0x385   :  { %v730_v55 = vadd.f32 %v729_v20, %v728_v28 }
 0x386   :  { %v724_v43 = vadd.f32 %v720_v11, %v644_v63 }
 0x388   :  { %v731_v25 = vsel %vm725_vm0, %v724_v43, 0.0 }
 0x389   :  { %v732_v3 = vadd.f32 %v731_v25, %v730_v55 }
 0x38b   :  { %733 = vadd.xlane.f32.xlu0 %v732_v3 }
 0x414   :  { %v734_v9 = vpop.xlane.xlu0 %733 }
 0x415   :  { %v735_v27 = vrot.slane %v734_v9, 4 }
 0x417   :  { %v736_v46 = vadd.f32 %v735_v27, %v734_v9 }
 0x419   :  { %v737_v21 = vrot.slane %v736_v46, 2 }
 0x41b   :  { %v738_v33 = vadd.f32 %v737_v21, %v736_v46 }
 0x41d   :  { %v739_v57 = vrot.slane %v738_v33, 1 }
 0x41f   :  { %v740_v22 = vadd.f32 %v739_v57, %v738_v33 }
 0x421   :  { %834 = vpush %v740_v22 }
 0x452   :  { %s835_s23 = spop %834 }
 0x453   :  { %s742_s24 = smul.f32 0.0078125, %s835_s23 }
 0x455   :  { %744 = sst [smem:[#allocation2]] %s742_s24 }
 0x456   :  { %752 = dma.smem_to_hbm %s947_s25, 16, %s1442_s1, [#allocation3]  }
 0x457   :  { %943 = dma.done.wait [#allocation3], 16  }
 0x458   :  { %944 = vsyncadd [#allocation3], 4294967280 }
 0x459   :  { %756 = sfence }
 0x45a   :  { %757 = vsyncpa [#allocation3], 1 }

</bundles_post_ra>
